<compile_context>
chip_gen: v7x
topology: tpu7x:2x2x1
jax: 0.10.0
libtpu: 0.0.40
codegen_flags: <defaults>
</compile_context>

<pallas_src>
import jax
import jax.numpy as jnp
from jax.experimental import pallas as pl
from jax.experimental.pallas import tpu as pltpu

_LANE = 128                      # TPU lane width (last dim of a vreg)
_SUBLANE = 8                     # f32 sublanes per vreg
_MAX_TILE_R = 8192               # rows-of-128 per block -> 4 MiB f32 output block
_VMEM_LIMIT = 40 * 1024 * 1024   # covers 2 x (8 + 4) MiB double-buffered blocks
_SMALL_BYTES = 1 << 20           # below ~1 MiB of traffic, plain XLA wins


def _round_up(x: int, m: int) -> int:
    return ((x + m - 1) // m) * m


def _choose_tile_r(r: int) -> int:
    """Sublane-aligned row tile: <= _MAX_TILE_R, and >= 2 grid steps when the
    input is large enough for v7x's two TensorCores to share the stream."""
    if r <= 2 * _SUBLANE:
        return r                       # one full-array block (exact dims are legal)
    n_tiles = max(2, pl.cdiv(r, _MAX_TILE_R))
    return _round_up(pl.cdiv(r, n_tiles), _SUBLANE)


def value_kernel(alpha_ref, x_ref, o_ref):
    # alpha_ref: SMEM (1,)               learnable scalar parameter
    # x_ref:     VMEM (2, tile_r, 128)   feature slab: x_ref[0]=a, x_ref[1]=b
    # o_ref:     VMEM (tile_r, 128)      output value slab
    alpha = alpha_ref[0]                          # single SMEM scalar read
    o_ref[...] = x_ref[0] * alpha + x_ref[1]      # 2 vld + vmul + vadd + 1 vst


def value_model_forward(x: jax.Array, alpha: jax.Array,
                        *, force_kernel: bool = False) -> jax.Array:
    """x: (2, N) float32, alpha: scalar float32 -> (1, N) float32."""
    two, n = x.shape
    assert two == 2, "ValueModel expects input[0,:] and input[1,:]"
    alpha_arr = jnp.asarray(alpha, x.dtype).reshape((1,))

    # --- small-N fast path: pallas_call launch + copies would dominate ------
    if not force_kernel and 3 * n * x.dtype.itemsize < _SMALL_BYTES:
        return (x[0, :] * alpha_arr + x[1, :])[None, :]

    # --- single slab: (2, N) -> (2, R, 128); pad only on the remainder path -
    r = pl.cdiv(n, _LANE)
    n_pad = r * _LANE
    x_slab = x if n_pad == n else jnp.pad(x, ((0, 0), (0, n_pad - n)))
    x_slab = x_slab.reshape(2, r, _LANE)          # metadata-only when no pad

    tile_r = _choose_tile_r(r)
    grid_r = pl.cdiv(r, tile_r)                   # trailing partial block masked

    out_dense = pl.pallas_call(
        value_kernel,
        out_shape=jax.ShapeDtypeStruct((r, _LANE), x.dtype),
        grid=(grid_r,),
        in_specs=[
            pl.BlockSpec((1,), lambda i: (0,),
                         memory_space=pltpu.MemorySpace.SMEM),       # alpha
            pl.BlockSpec((2, tile_r, _LANE), lambda i: (0, i, 0)),   # x slab
        ],
        out_specs=pl.BlockSpec((tile_r, _LANE), lambda i: (i, 0)),
        compiler_params=pltpu.CompilerParams(
            dimension_semantics=("parallel",),
            vmem_limit_bytes=_VMEM_LIMIT,
        ),
    )(alpha_arr, x_slab)

    # --- back to the module's (1, N) output shape ---------------------------
    if n_pad == n:
        return out_dense.reshape(1, n)            # free reshape, no copy
    return out_dense.reshape(n_pad)[:n][None, :]  # slice copy only when padded


if __name__ == "__main__":
    # Deterministic parameter init (matches nn.Parameter(torch.Tensor([alpha]))).
    alpha_init = jnp.float32(0.5)

    key = jax.random.PRNGKey(0)
    k_small, k_rag = jax.random.split(key)

    # 1) Default path at the module's small shape (fast XLA path).
    x_small = jax.random.normal(k_small, (2, 256), dtype=jnp.float32)
    out_small = jax.block_until_ready(value_model_forward(x_small, alpha_init))
    ref_small = (x_small[0, :] * alpha_init + x_small[1, :])[None, :]
    assert out_small.shape == (1, 256)
    assert jnp.allclose(out_small, ref_small, atol=1e-6, rtol=1e-6)

    # 2) Pallas kernel path, N a multiple of 128 (zero-copy slab, no pad/slice).
    out_k = jax.block_until_ready(
        value_model_forward(x_small, alpha_init, force_kernel=True))
    assert out_k.shape == (1, 256)
    assert jnp.allclose(out_k, ref_small, atol=1e-6, rtol=1e-6)

    # 3) Pallas kernel path with a ragged N (remainder pad + slice path,
    #    2 grid steps with a masked trailing block).
    x_rag = jax.random.normal(k_rag, (2, 2053), dtype=jnp.float32)
    out_r = jax.block_until_ready(
        value_model_forward(x_rag, alpha_init, force_kernel=True))
    ref_r = (x_rag[0, :] * alpha_init + x_rag[1, :])[None, :]
    assert out_r.shape == (1, 2053)
    assert jnp.allclose(out_r, ref_r, atol=1e-6, rtol=1e-6)

    print("KERNEL_OK")
</pallas_src>

<mosaic_0001>
module attributes {stable_mosaic.version = 11 : i64} {
  func.func @value_kernel(%arg0: i32, %arg1: memref<1xf32, #tpu.memory_space<smem>>, %arg2: memref<2x2x128xf32, #tpu.memory_space<vmem>>, %arg3: memref<2x128xf32, #tpu.memory_space<vmem>>) attributes {dimension_semantics = [#tpu.dimension_semantics<parallel>], iteration_bounds = array<i64: 1>, scalar_prefetch = 0 : i64, scratch_operands = 0 : i64, tpu.core_type = #tpu.core_type<tc>, window_params = [{transform_indices = @transform_0, window_bounds = array<i64: 1>}, {transform_indices = @transform_1, window_bounds = array<i64: 2, 2, 128>}, {transform_indices = @transform_2, window_bounds = array<i64: 2, 128>}]} {
    %c0 = arith.constant 0 : index
    %0 = memref.load %arg1[%c0] : memref<1xf32, #tpu.memory_space<smem>>
    %c0_0 = arith.constant 0 : index
    %c0_1 = arith.constant 0 : index
    %c0_2 = arith.constant 0 : index
    %1 = vector.load %arg2[%c0_0, %c0_1, %c0_2] : memref<2x2x128xf32, #tpu.memory_space<vmem>>, vector<1x2x128xf32>
    %2 = vector.shape_cast %1 : vector<1x2x128xf32> to vector<2x128xf32>
    %3 = vector.broadcast %0 : f32 to vector<2x128xf32>
    %4 = arith.mulf %2, %3 : vector<2x128xf32>
    %c1 = arith.constant 1 : index
    %c0_3 = arith.constant 0 : index
    %c0_4 = arith.constant 0 : index
    %5 = vector.load %arg2[%c1, %c0_3, %c0_4] : memref<2x2x128xf32, #tpu.memory_space<vmem>>, vector<1x2x128xf32>
    %6 = vector.shape_cast %5 : vector<1x2x128xf32> to vector<2x128xf32>
    %7 = arith.addf %4, %6 : vector<2x128xf32>
    %c0_5 = arith.constant 0 : index
    %c0_6 = arith.constant 0 : index
    %8 = vector.load %arg3[%c0_5, %c0_6] : memref<2x128xf32, #tpu.memory_space<vmem>>, vector<2x128xf32>
    tpu.vector_store %arg3[%c0_5, %c0_6], %7 {strides = array<i32>} : memref<2x128xf32, #tpu.memory_space<vmem>>, vector<2x128xf32>,
    return
  }
  func.func @transform_0(%arg0: i32) -> i32 {
    %c0_i32 = arith.constant 0 : i32
    %c0_i32_0 = arith.constant 0 : i32
    return %c0_i32 : i32
  }
  func.func @transform_1(%arg0: i32) -> (i32, i32, i32) {
    %c0_i32 = arith.constant 0 : i32
    %c0_i32_0 = arith.constant 0 : i32
    %c0_i32_1 = arith.constant 0 : i32
    return %c0_i32, %arg0, %c0_i32_0 : i32, i32, i32
  }
  func.func @transform_2(%arg0: i32) -> (i32, i32) {
    %c0_i32 = arith.constant 0 : i32
    %c0_i32_0 = arith.constant 0 : i32
    return %arg0, %c0_i32 : i32, i32
  }
}

</mosaic_0001>

<bundles_post_ra>
// kernel: tpu_custom_call.1
= control target key start
LH: loop header
LB: loop body
LE: loop exit
PB: predicated region body
PF: predicated region fallthrough
CT: control target
= control target key end

     0   :  { %8 = vsyncpa [#allocation4], 0  ;;  %s148_s0 = inlined_call_operand.<no memory space> [shape: f32[1], index: 0, kind: input, shape index: {}]   ;;  %s149_s1 = inlined_call_operand.hbm [shape: f32[2,2,128], index: 1, kind: input, shape index: {}]   ;;  %s150_s2 = inlined_call_operand.hbm [shape: f32[2,128], index: 2, kind: output, shape index: {}]  }
   0x1   :  { %9 = vsyncpa [#allocation5], 0  ;;  %s102_s9 = smov [#allocation3]   ;;  %s54_s13 = scalar_lea.hbm %s149_s1, 64 }
   0x2   :  { %s17_s10 = sshll.u32 %s102_s9, 4  ;;  %p55_p0 = scmp.ne.s32.totalorder %s149_s1, %s54_s13  ;;  %s18_s10 = int_to_ptr.vmem [resolvable:$true] %s17_s10 }
   0x3   :  { %p58_p1 = scmp.lt.u32.totalorder %s54_s13, %s149_s1 }
   0x5   :  { %p60_p2 = pnand %p58_p1, %p55_p0 }
   0x7   :  { %63 = shalt.err (!%p60_p2)
}
   0x8   :  { %s64_s18 = scalar_lea.vmem %s18_s10, 64  ;;  %p69_p4 = scmp.lt.s32.totalorder %s18_s10, %s18_s10 }
   0x9   :  { %p65_p3 = scmp.ne.s32.totalorder %s18_s10, %s64_s18  ;;  %p70_p5 = scmp.lt.s32.totalorder %s64_s18, %s64_s18 }
   0xb   :  { %p71_p6 = por %p70_p5, %p69_p4 }
   0xd   :  { %p72_p7 = pnand %p71_p6, %p65_p3 }
   0xf   :  { %75 = shalt.err (!%p72_p7)
}
  0x10   :  { %s103_s19 = smov 32   ;;  %s104_s20 = smov 2  }
  0x11   :  { %23 = dma.hbm_to_vmem [thread:$0]  %s149_s1, 64, %s18_s10, [#allocation4], %s103_s19, %s103_s19, %s104_s20  }
  0x12   :  { %98 = dma.done.wait [#allocation4], 64  }
  0x13   :  { %99 = vsyncadd [#allocation4], 4294967232  ;;  %v29_v0 = vstv %s148_s0  ;;  %v28_v1 = vld [vmem:[#allocation3] sm:$0x3]  ;;  %v32_v2 = vld [vmem:[#allocation3 + $0x2] sm:$0x3] }
  0x14   :  { %s105_s25 = smov [#allocation6]   ;;  %v30_v3 = vmul.f32 %v29_v0, %v28_v1 }
  0x15   :  { %s41_s26 = sshll.u32 %s105_s25, 4  ;;  %s42_s26 = int_to_ptr.vmem [resolvable:$true] %s41_s26 }
  0x16   :  { %v33_v4 = vadd.f32 %v32_v2, %v30_v3  ;;  %s76_s27 = scalar_lea.vmem %s42_s26, 32  ;;  %p81_p9 = scmp.lt.s32.totalorder %s42_s26, %s42_s26 }
  0x17   :  { %p77_p8 = scmp.ne.s32.totalorder %s42_s26, %s76_s27  ;;  %p82_p10 = scmp.lt.s32.totalorder %s76_s27, %s76_s27 }
  0x18   :  { %34 = vst [vmem:[#allocation6] sm:$0x3] %v33_v4 }
  0x19   :  { %p83_p11 = por %p82_p10, %p81_p9 }
  0x1b   :  { %p84_p12 = pnand %p83_p11, %p77_p8 }
  0x1d   :  { %87 = shalt.err (!%p84_p12)
}
  0x1e   :  { %s88_s29 = scalar_lea.hbm %s150_s2, 32 }
  0x1f   :  { %p89_p13 = scmp.ne.s32.totalorder %s150_s2, %s88_s29  ;;  %p92_p0 = scmp.lt.u32.totalorder %s88_s29, %s150_s2 }
  0x21   :  { %p94_p1 = pnand %p92_p0, %p89_p13 }
  0x23   :  { %97 = shalt.err (!%p94_p1)
}
  0x24   :  { %44 = dma.vmem_to_hbm [thread:$0]  %s42_s26, 32, %s150_s2, [#allocation5]  }
  0x25   :  { %100 = dma.done.wait [#allocation5], 32  }
  0x26   :  { %101 = vsyncadd [#allocation5], 4294967264 }
  0x27   :  { %48 = vsyncpa [#allocation4], 1 }
  0x28   :  { %49 = vsyncpa [#allocation5], 1 }

</bundles_post_ra>
